<compile_context>
chip_gen: v7x
topology: tpu7x:2x2x1
jax: 0.10.0
libtpu: 0.0.40
codegen_flags: <defaults>
</compile_context>

<pallas_src>
import jax
import jax.numpy as jnp
import numpy as np
from jax.experimental import pallas as pl
from jax.experimental.pallas import tpu as pltpu


def _pick_tile(total, target, align):
    """Largest multiple of `align` that divides `total` and is <= `target`.
    Falls back to the full extent (always legal as a BlockSpec dim)."""
    best = total
    if total % align == 0:
        for cand in range(align, min(total, target) + 1, align):
            if total % cand == 0:
                best = cand
    return best


# ----------------------------- stage 1 ----------------------------------------
def _pooled_kernel(x_ref, w_ref, shift_ref, y_ref, acc_ref):
    """Global average pool + 1x1 conv + BN + ReLU, one (batch, Cin-tile) step.

    x_ref:     (1, TCin, HW)  input chunk, lane-dense flattened spatial axis
    w_ref:     (TCin, Cout)   conv weight with BN scale and 1/(H*W) pre-folded
    shift_ref: (1, Cout)      BN shift (beta - running_mean * scale)
    y_ref:     (1, 1, Cout)   pooled + BN + ReLU result (f32)
    acc_ref:   (1, Cout) f32  VMEM accumulator, resident across the Cin axis
    """
    k = pl.program_id(1)

    @pl.when(k == 0)
    def _init():
        acc_ref[...] = jnp.zeros_like(acc_ref)

    # Spatial sum = single lane-axis reduce (HW is the lane axis); widen to f32
    # for accumulation accuracy.
    ch_sum = jnp.sum(x_ref[...].astype(jnp.float32), axis=2)          # (1, TCin)

    # Partial contraction over this Cin tile. The 1/(H*W) mean factor and the BN
    # scale are folded into w, so this accumulates the pre-shift BN output.
    acc_ref[...] += jnp.dot(ch_sum, w_ref[...],
                            preferred_element_type=jnp.float32)       # (1, Cout)

    @pl.when(k == pl.num_programs(1) - 1)
    def _finalize():
        y = jnp.maximum(acc_ref[...] + shift_ref[...], 0.0)           # (1, Cout)
        y_ref[...] = y[None]                                          # (1, 1, Cout)


# ----------------------------- stage 2 ----------------------------------------
def _broadcast_kernel(y_ref, o_ref):
    """Broadcast the per-channel pooled value over a lane-dense spatial tile.

    Equivalent to bilinear upsampling of a 1x1 map with align_corners=True.

    y_ref: (1, Cout, 1)    pooled value (f32), Cout on sublanes
    o_ref: (1, Cout, THW)  output tile (Cout on sublanes, spatial on lanes)
    """
    cout, thw = o_ref.shape[1], o_ref.shape[2]
    chunk = 128 if thw >= 128 else thw
    val = y_ref[...].astype(o_ref.dtype)                 # (1, Cout, 1)
    tile = jnp.broadcast_to(val, (1, cout, chunk))       # hoisted once per step

    # Chunked, statically-addressed full-lane stores: never materializes the
    # whole (Cout, THW) broadcast in vregs.
    n_full = thw // chunk
    for i in range(n_full):
        o_ref[:, :, i * chunk:(i + 1) * chunk] = tile
    rem = thw - n_full * chunk
    if rem:
        o_ref[:, :, n_full * chunk:thw] = jnp.broadcast_to(val, (1, cout, rem))


# ----------------------------- wrapper -----------------------------------------
def aspp_pooling(x, conv_w, bn_gamma, bn_beta, bn_mean, bn_var, eps=1e-5):
    """x: (N, Cin, H, W); conv_w: (Cout, Cin) from a 1x1 Conv2d weight (Cout,Cin,1,1)."""
    n, cin, h, w = x.shape
    cout = conv_w.shape[0]
    hw = h * w

    # Fold inference-mode BN and the global-average 1/(H*W) into weight / shift.
    scale = bn_gamma.astype(jnp.float32) / jnp.sqrt(bn_var.astype(jnp.float32) + eps)
    shift = (bn_beta.astype(jnp.float32) - bn_mean.astype(jnp.float32) * scale)
    shift = shift.reshape(1, cout)
    w_folded = ((conv_w.astype(jnp.float32) * scale[:, None]) * (1.0 / hw)).T  # (Cin, Cout)

    # Lane-dense spatial layout: (N, C, H*W). Contiguous reshape => free.
    x_flat = x.reshape(n, cin, hw)

    # ---- Stage 1: GAP + 1x1 conv + BN + ReLU -> (N, 1, Cout) f32 -------------
    # Cin tile sized so the f32-widened input block stays <= ~2 MiB: bounds
    # per-step VMEM (v7x has only 64 MiB physical) and vreg/spill pressure.
    tgt_cin = max(8, (2 * 1024 * 1024) // (hw * 4))
    t_cin = _pick_tile(cin, tgt_cin, 8)
    k_cin = cin // t_cin

    blk1 = (2 * t_cin * hw * x.dtype.itemsize        # double-buffered input
            + 2 * t_cin * cout * 4                   # double-buffered weight
            + 6 * max(cout, 128) * 8 * 4)            # shift / y / acc (padded)
    vmem1 = int(min(max(2 * blk1, 32 * 1024 * 1024), 64 * 1024 * 1024))

    pooled = pl.pallas_call(
        _pooled_kernel,
        out_shape=jax.ShapeDtypeStruct((n, 1, cout), jnp.float32),
        grid_spec=pltpu.PrefetchScalarGridSpec(
            num_scalar_prefetch=0,
            grid=(n, k_cin),
            in_specs=[
                pl.BlockSpec((1, t_cin, hw), lambda b, k: (b, k, 0)),
                pl.BlockSpec((t_cin, cout), lambda b, k: (k, 0)),
                pl.BlockSpec((1, cout), lambda b, k: (0, 0)),
            ],
            out_specs=pl.BlockSpec((1, 1, cout), lambda b, k: (b, 0, 0)),
            scratch_shapes=[pltpu.VMEM((1, cout), jnp.float32)],
        ),
        compiler_params=pltpu.CompilerParams(
            dimension_semantics=("parallel", "arbitrary"),
            vmem_limit_bytes=vmem1,
        ),
    )(x_flat, w_folded, shift)

    # (N, 1, Cout) -> (N, Cout, 1): identical linear layout, free metadata
    # reshape; gives stage 2 Cout on sublanes so the broadcast is a pure lane
    # splat with no in-kernel relayout.
    pooled_col = pooled.reshape(n, cout, 1)

    # ---- Stage 2: broadcast == 1x1 bilinear upsample (align_corners=True) ----
    t_hw = _pick_tile(hw, 1024, 128)     # up to 8 full-lane (128) chunks / step
    s_hw = hw // t_hw

    blk2 = 2 * cout * t_hw * x.dtype.itemsize + 2 * cout * 128 * 4
    vmem2 = int(min(max(2 * blk2, 32 * 1024 * 1024), 64 * 1024 * 1024))

    out_flat = pl.pallas_call(
        _broadcast_kernel,
        out_shape=jax.ShapeDtypeStruct((n, cout, hw), x.dtype),
        grid_spec=pltpu.PrefetchScalarGridSpec(
            num_scalar_prefetch=0,
            grid=(n, s_hw),
            in_specs=[pl.BlockSpec((1, cout, 1), lambda b, s: (b, 0, 0))],
            out_specs=pl.BlockSpec((1, cout, t_hw), lambda b, s: (b, 0, s)),
        ),
        compiler_params=pltpu.CompilerParams(
            dimension_semantics=("parallel", "parallel"),
            vmem_limit_bytes=vmem2,
        ),
    )(pooled_col)

    return out_flat.reshape(n, cout, h, w)


# ----------------------------- reference ----------------------------------------
def aspp_pooling_ref(x, conv_w, bn_gamma, bn_beta, bn_mean, bn_var, eps=1e-5):
    mean = jnp.mean(x.astype(jnp.float32), axis=(2, 3))            # (N, Cin)
    pooled = mean @ conv_w.T.astype(jnp.float32)                   # (N, Cout)
    scale = bn_gamma / jnp.sqrt(bn_var + eps)
    y = jnp.maximum(pooled * scale + (bn_beta - bn_mean * scale), 0.0)
    n, cout = y.shape
    h, w = x.shape[2], x.shape[3]
    return jnp.broadcast_to(y[:, :, None, None], (n, cout, h, w)).astype(x.dtype)


if __name__ == "__main__":
    key = jax.random.PRNGKey(0)
    k_x, k_w, k_g, k_b, k_m, k_v = jax.random.split(key, 6)

    N, C_IN, C_OUT, H, W = 2, 4, 8, 16, 16

    x = jax.random.normal(k_x, (N, C_IN, H, W), dtype=jnp.float32)
    conv_w = jax.random.normal(k_w, (C_OUT, C_IN), dtype=jnp.float32) * 0.1
    bn_gamma = 1.0 + 0.1 * jax.random.normal(k_g, (C_OUT,), dtype=jnp.float32)
    bn_beta = 0.1 * jax.random.normal(k_b, (C_OUT,), dtype=jnp.float32)
    bn_mean = 0.05 * jax.random.normal(k_m, (C_OUT,), dtype=jnp.float32)
    bn_var = 0.5 + jnp.abs(jax.random.normal(k_v, (C_OUT,), dtype=jnp.float32))

    out = aspp_pooling(x, conv_w, bn_gamma, bn_beta, bn_mean, bn_var)
    out = jax.block_until_ready(out)

    ref = aspp_pooling_ref(x, conv_w, bn_gamma, bn_beta, bn_mean, bn_var)
    np.testing.assert_allclose(np.asarray(out), np.asarray(ref), rtol=1e-5, atol=1e-5)

    print("KERNEL_OK")
</pallas_src>

<mosaic_0001>
module attributes {stable_mosaic.version = 11 : i64} {
  func.func @_pooled_kernel(%arg0: i32, %arg1: i32, %arg2: memref<1x4x256xf32, #tpu.memory_space<vmem>>, %arg3: memref<4x8xf32, #tpu.memory_space<vmem>>, %arg4: memref<1x8xf32, #tpu.memory_space<vmem>>, %arg5: memref<1x1x8xf32, #tpu.memory_space<vmem>>, %arg6: memref<1x8xf32, #tpu.memory_space<vmem>>) attributes {dimension_semantics = [#tpu.dimension_semantics<parallel>, #tpu.dimension_semantics<arbitrary>], iteration_bounds = array<i64: 2, 1>, scalar_prefetch = 0 : i64, scratch_operands = 1 : i64, tpu.core_type = #tpu.core_type<tc>, window_params = [{transform_indices = @transform_0, window_bounds = array<i64: 1, 4, 256>}, {transform_indices = @transform_1, window_bounds = array<i64: 4, 8>}, {pipeline_mode = #tpu.pipeline_mode<synchronous>, transform_indices = @transform_2, window_bounds = array<i64: 1, 8>}, {transform_indices = @transform_3, window_bounds = array<i64: 1, 1, 8>}]} {
    %c0_i32 = arith.constant 0 : i32
    %0 = arith.cmpi eq, %arg1, %c0_i32 : i32
    %1 = arith.extui %0 : i1 to i32
    %c0_i32_0 = arith.constant 0 : i32
    %2 = arith.cmpi ne, %1, %c0_i32_0 : i32
    scf.if %2 {
      %cst_12 = arith.constant 0.000000e+00 : f32
      %13 = vector.broadcast %cst_12 : f32 to vector<1x8xf32>
      %c0_13 = arith.constant 0 : index
      %c0_14 = arith.constant 0 : index
      %14 = vector.load %arg6[%c0_13, %c0_14] : memref<1x8xf32, #tpu.memory_space<vmem>>, vector<1x8xf32>
      tpu.vector_store %arg6[%c0_13, %c0_14], %13 {strides = array<i32>} : memref<1x8xf32, #tpu.memory_space<vmem>>, vector<1x8xf32>,
    } else {
    }
    %c0 = arith.constant 0 : index
    %c0_1 = arith.constant 0 : index
    %c0_2 = arith.constant 0 : index
    %3 = vector.load %arg2[%c0, %c0_1, %c0_2] : memref<1x4x256xf32, #tpu.memory_space<vmem>>, vector<1x4x256xf32>
    %cst = arith.constant dense<0.000000e+00> : vector<1x4xf32>
    %4 = vector.multi_reduction <add>, %3, %cst [2] : vector<1x4x256xf32> to vector<1x4xf32>
    %c0_3 = arith.constant 0 : index
    %c0_4 = arith.constant 0 : index
    %5 = vector.load %arg6[%c0_3, %c0_4] : memref<1x8xf32, #tpu.memory_space<vmem>>, vector<1x8xf32>
    %c0_5 = arith.constant 0 : index
    %c0_6 = arith.constant 0 : index
    %6 = vector.load %arg3[%c0_5, %c0_6] : memref<4x8xf32, #tpu.memory_space<vmem>>, vector<4x8xf32>
    %cst_7 = arith.constant dense<0.000000e+00> : vector<1x8xf32>
    %7 = tpu.matmul %4, %6, %cst_7 {dimension_numbers = #tpu.dot_dimension_numbers<[1], [0], [0], [1], [0, 0, 1, 1], [], []>} : vector<1x4xf32>, vector<4x8xf32>, vector<1x8xf32> -> vector<1x8xf32>
    %8 = arith.addf %5, %7 : vector<1x8xf32>
    %c0_8 = arith.constant 0 : index
    %c0_9 = arith.constant 0 : index
    %9 = vector.load %arg6[%c0_8, %c0_9] : memref<1x8xf32, #tpu.memory_space<vmem>>, vector<1x8xf32>
    tpu.vector_store %arg6[%c0_8, %c0_9], %8 {strides = array<i32>} : memref<1x8xf32, #tpu.memory_space<vmem>>, vector<1x8xf32>,
    %c0_i32_10 = arith.constant 0 : i32
    %10 = arith.cmpi eq, %arg1, %c0_i32_10 : i32
    %11 = arith.extui %10 : i1 to i32
    %c0_i32_11 = arith.constant 0 : i32
    %12 = arith.cmpi ne, %11, %c0_i32_11 : i32
    scf.if %12 {
      %c0_12 = arith.constant 0 : index
      %c0_13 = arith.constant 0 : index
      %13 = vector.load %arg6[%c0_12, %c0_13] : memref<1x8xf32, #tpu.memory_space<vmem>>, vector<1x8xf32>
      %c0_14 = arith.constant 0 : index
      %c0_15 = arith.constant 0 : index
      %14 = vector.load %arg4[%c0_14, %c0_15] : memref<1x8xf32, #tpu.memory_space<vmem>>, vector<1x8xf32>
      %15 = arith.addf %13, %14 : vector<1x8xf32>
      %cst_16 = arith.constant 0.000000e+00 : f32
      %16 = vector.broadcast %cst_16 : f32 to vector<1x8xf32>
      %17 = arith.maximumf %15, %16 : vector<1x8xf32>
      %18 = vector.shape_cast %17 : vector<1x8xf32> to vector<1x1x8xf32>
      %c0_17 = arith.constant 0 : index
      %c0_18 = arith.constant 0 : index
      %c0_19 = arith.constant 0 : index
      %19 = vector.load %arg5[%c0_17, %c0_18, %c0_19] : memref<1x1x8xf32, #tpu.memory_space<vmem>>, vector<1x1x8xf32>
      tpu.vector_store %arg5[%c0_17, %c0_18, %c0_19], %18 {strides = array<i32>} : memref<1x1x8xf32, #tpu.memory_space<vmem>>, vector<1x1x8xf32>,
    } else {
    }
    return
  }
  func.func @transform_0(%arg0: i32, %arg1: i32) -> (i32, i32, i32) {
    %c0_i32 = arith.constant 0 : i32
    %c0_i32_0 = arith.constant 0 : i32
    return %arg0, %arg1, %c0_i32 : i32, i32, i32
  }
  func.func @transform_1(%arg0: i32, %arg1: i32) -> (i32, i32) {
    %c0_i32 = arith.constant 0 : i32
    %c0_i32_0 = arith.constant 0 : i32
    return %arg1, %c0_i32 : i32, i32
  }
  func.func @transform_2(%arg0: i32, %arg1: i32) -> (i32, i32) {
    %c0_i32 = arith.constant 0 : i32
    %c0_i32_0 = arith.constant 0 : i32
    %c0_i32_1 = arith.constant 0 : i32
    return %c0_i32, %c0_i32_0 : i32, i32
  }
  func.func @transform_3(%arg0: i32, %arg1: i32) -> (i32, i32, i32) {
    %c0_i32 = arith.constant 0 : i32
    %c0_i32_0 = arith.constant 0 : i32
    %c0_i32_1 = arith.constant 0 : i32
    return %arg0, %c0_i32, %c0_i32_0 : i32, i32, i32
  }
}

</mosaic_0001>

<bundles_post_ra>
// kernel: tpu_custom_call.1
= control target key start
LH: loop header
LB: loop body
LE: loop exit
PB: predicated region body
PF: predicated region fallthrough
CT: control target
= control target key end

     0   :  { %8 = vsyncpa [#allocation4], 0  ;;  %s930_s0 = inlined_call_operand.hbm [shape: f32[2,4,256], index: 0, kind: input, shape index: {}]   ;;  %s931_s1 = inlined_call_operand.hbm [shape: f32[4,8], index: 1, kind: input, shape index: {}]   ;;  %s932_s2 = inlined_call_operand.vmem [shape: f32[1,8], index: 2, kind: input, shape index: {}]   ;;  %s933_s3 = inlined_call_operand.hbm [shape: f32[2,1,8], index: 3, kind: output, shape index: {}]  }
   0x1   :  { %10 = vsyncpa [#allocation4 + $0x1], 0 }
   0x2   :  { %11 = vsyncpa [#allocation7], 0 }
   0x3   :  { %12 = vsyncpa [#allocation5], 0 }
   0x4   :  { %14 = vsyncpa [#allocation5 + $0x1], 0  ;;  %s707_s12 = smov 0   ;;  %s709_s13 = smov 0  }
   0x5   :  { %s711_s14 = smov 0   ;;  %s713_s15 = smov 0  }
   0x6   :  { %s715_s16 = smov 0   ;;  %s717_s17 = smov 0  }
   0x7 LB: > { %s436_s18 = sadd.s32 4294967295, %s680_s17   ;;  %s437_s19 = sadd.s32 4294967294, %s680_s17   ;;  %s680_s17 = sphi %s717_s17, %s20_s17   ;;  %s676_s16 = sphi %s715_s16, %s958_s16   ;;  %s672_s15 = sphi %s713_s15, %s957_s15   ;;  %s668_s14 = sphi %s711_s14, %s956_s14   ;;  %s664_s13 = sphi %s709_s13, %s955_s13   ;;  %s660_s12 = sphi %s707_s12, %s954_s12  }
   0x8   : > { %p54_p0 = scmp.ne.s32.totalorder %s664_s13, %s660_s12  ;;  %p741_p1 = scmp.eq.s32.totalorder %s436_s18, 0 }
   0x9   : > { %p745_p2 = scmp.eq.s32.totalorder %s436_s18, 1  ;;  %p131_p3 = scmp.eq.s32.totalorder %s437_s19, 1 }
   0xa   : > { %s938_s20 = scalar_select %p741_p1, 1, 0 }
   0xb   : > { %s939_s21 = scalar_select %p745_p2, 1, 0 }
   0xc   : > { %p751_p4 = por %p741_p1, %p54_p0  ;;  %p438_p5 = scmp.ge.s32.totalorder %s680_s17, 1 }
   0xd   : > { %p756_p6 = por %p131_p3, %p54_p0  ;;  %p138_p7 = scmp.lt.s32.totalorder %s680_s17, 3 }
   0xe   : > { %s940_s22 = scalar_select %p751_p4, 1, 0 }
   0xf   : > { %s941_s23 = scalar_select %p756_p6, 1, 0 }
  0x10   : > { %p761_p8 = pnand %p438_p5, %p138_p7  ;;  %s682_s25 = smov [#allocation6]  }
  0x11   : > { %s153_s26 = sshll.u32 %s682_s25, 4  ;;  %s32_s28 = sadd.s32 1, %s676_s16  ;;  %s154_s26 = int_to_ptr.vmem [resolvable:$true] %s153_s26 }
  0x12   : > { %s942_s24 = scalar_select %p761_p8, 1, 0 }
  0x13   : > { %p468_p10 = pneg %p761_p8  ;;  %s41_s29 = sadd.s32 1, %s668_s14 }
  0x14   : > { %p776_p12 = scmp.ge.s32.totalorder %s32_s28, 2  ;;  %s536_s6 = scalar_lea.hbm %s931_s1, 64 }
  0x15   : > { %p770_p11 = pnand %p468_p10, %p741_p1  ;;  %p537_p13 = scmp.ne.s32.totalorder %s931_s1, %s536_s6 }
  0x16   : > { %s944_s30 = scalar_select %p776_p12, 1, 0 }
  0x17   : > { %p538_p0 = pneg %p770_p11  ;;  %p543_p7 = scmp.lt.u32.totalorder %s536_s6, %s931_s1 }
  0x19   : > { %p539_p3 = pnand %p538_p0, %p537_p13 }
  0x1b   : > { %p540_p5 = pneg %p539_p3 }
  0x1d   : > { %p545_p10 = pnand %p543_p7, %p540_p5 }
  0x1f   : > { %548 = shalt.err (!%p545_p10)
}
  0x20   : > { %s549_s11 = scalar_lea.vmem %s154_s26, 64  ;;  %p557_p4 = scmp.lt.s32.totalorder %s154_s26, %s154_s26 }
  0x21   : > { %p550_p9 = scmp.ne.s32.totalorder %s154_s26, %s549_s11  ;;  %p558_p8 = scmp.lt.s32.totalorder %s549_s11, %s549_s11 }
  0x23   : > { %p552_p6 = pnand %p550_p9, %p538_p0  ;;  %p559_p2 = por %p558_p8, %p557_p4 }
  0x25   : > { %p553_p1 = pneg %p552_p6 }
  0x27   : > { %p560_p12 = pnand %p559_p2, %p553_p1 }
  0x29   : > { %563 = shalt.err (!%p560_p12)
}
  0x2a   : > { %471 = dma.hbm_to_vmem [thread:$0]  (!%p770_p11), %s931_s1, 64, %s154_s26, [#allocation7]  }
  0x2b   : > { %p945_p4 = scmp.ne.s32.totalorder %s944_s30, 0  ;;  %p48_p1 = scmp.ne.s32.totalorder %s668_s14, %s664_s13 }
  0x2c   : > { %p49_p2 = scmp.eq.s32.totalorder %s680_s17, 0  ;;  %p481_p6 = scmp.lt.s32.totalorder %s680_s17, 2 }
  0x2d   : > { %s960_s28 = smov (%p945_p4, %s32_s28), 0  ;;  %p946_p12 = scmp.ne.s32.totalorder %s939_s21, 0 }
  0x2e   : > { %s36_s25 = ssub.s32 %s676_s16, %s960_s28  ;;  %p50_p9 = por %p49_p2, %p48_p1 }
  0x2f   : > { %p39_p8 = scmp.eq.s32.totalorder %s36_s25, 0  ;;  %p808_p13 = por %p946_p12, %p48_p1 }
  0x30   : > { %s167_s4 = sand.u32 1, %s668_s14   ;;  %s452_s30 = sshll.u32 %s676_s16, 7 }
  0x31   : > { %s816_s5 = scalar_select %p39_p8, %s668_s14, %s41_s29  }
  0x32   : > { %s441_s26 = sshll.u32 %s167_s4, 3  ;;  %s822_s8 = scalar_lea.hbm %s930_s0, %s452_s30 }
  0x33   : > { %s171_s21 = scalar_lea.vmem [#allocation3], %s441_s26  ;;  %p826_p11 = pnand %p481_p6, %p50_p9 }
  0x34   : > { %s181_s9 = sshll.u32 %s171_s21, 4  ;;  %s168_s29 = scalar_lea.sflag [#allocation4], %s167_s4  ;;  %s824_s9 = int_to_ptr.vmem [resolvable:$true] %s181_s9 }
  0x35   : > { %s564_s11 = scalar_lea.hbm %s822_s8, 128  ;;  %p566_p3 = pneg %p826_p11 }
  0x36   : > { %p565_p0 = scmp.ne.s32.totalorder %s822_s8, %s564_s11  ;;  %s569_s25 = scalar_lea.hbm %s930_s0, 256 }
  0x37   : > { %p570_p10 = scmp.lt.u32.totalorder %s822_s8, %s930_s0  ;;  %p571_p4 = scmp.lt.u32.totalorder %s569_s25, %s564_s11 }
  0x38   : > { %p567_p5 = pnand %p566_p3, %p565_p0  ;;  %p573_p2 = scmp.lt.u32.totalorder %s564_s11, %s822_s8 }
  0x39   : > { %p572_p1 = por %p571_p4, %p570_p10 }
  0x3a   : > { %p568_p7 = pneg %p567_p5 }
  0x3b   : > { %p574_p6 = por %p573_p2, %p572_p1 }
  0x3d   : > { %p575_p8 = pnand %p574_p6, %p568_p7 }
  0x3f   : > { %578 = shalt.err (!%p575_p8)
}
  0x40   : > { %s579_s4 = scalar_lea.vmem %s824_s9, 128  ;;  %s683_s6 = smov [#allocation3]  }
  0x41   : > { %p580_p9 = scmp.ne.s32.totalorder %s824_s9, %s579_s4  ;;  %s584_s7 = sshll.u32 %s683_s6, 4  ;;  %s585_s7 = int_to_ptr.vmem [resolvable:$false] %s584_s7 }
  0x42   : > { %s586_s21 = scalar_lea.vmem %s585_s7, 256  ;;  %p587_p5 = scmp.lt.s32.totalorder %s824_s9, %s585_s7 }
  0x43   : > { %p582_p12 = pnand %p580_p9, %p566_p3  ;;  %p588_p10 = scmp.lt.s32.totalorder %s586_s21, %s579_s4 }
  0x45   : > { %p583_p0 = pneg %p582_p12  ;;  %p589_p4 = por %p588_p10, %p587_p5 }
  0x47   : > { %p590_p1 = pnand %p589_p4, %p583_p0 }
  0x49   : > { %593 = shalt.err (!%p590_p1)
}
  0x4a   : > { %475 = dma.hbm_to_vmem [thread:$0]  (!%p826_p11), %s822_s8, 128, %s824_s9, %s168_s29  }
  0x4b   : > { %p949_p7 = scmp.ne.s32.totalorder %s942_s24, 0 }
  0x4c   : > { %s858_s11 = sand.u32 (!%p949_p7), 1, %s664_s13   ;;  %p950_p3 = scmp.ne.s32.totalorder (!%p949_p7), %s940_s22, 0 }
  0x4d   : > { %190 = sbr.rel (%p949_p7) target bundleno = 478 (0x1de), region = 32  ;;  %s445_s18 = sshll.u32 (!%p949_p7), %s858_s11, 3 }
  0x4e   : > { %s193_s19 = scalar_lea.sflag (!%p949_p7), [#allocation4], %s858_s11  ;;  %s196_s25 = scalar_lea.vmem (!%p949_p7), [#allocation3], %s445_s18 }
  0x54   : > { %647 = dma.done.wait (%p950_p3), %s193_s19, 128  }
  0x55   : > { %649 = vsyncadd (%p950_p3), %s193_s19, 4294967168  ;;  %p951_p2 = scmp.ne.s32.totalorder %s938_s20, 0 }
  0x57   : > { %651 = dma.done.wait (%p951_p2), [#allocation7], 64  }
  0x58   : > { %653 = vsyncadd (%p951_p2), [#allocation7], 4294967232  ;;  %vm232_vm0 = vcmask 1043456   ;;  %v228_v0 = vld [vmem:[%s196_s25] sm:$0xff]  ;;  %vm226_vm1 = vcmask 57344   ;;  %v684_v5 = vmov 0.0   ;;  %v241_v7 = vlaneseq }
  0x59   : > { %v230_v1 = vcombine.high %v228_v0, %v228_v0  ;;  %v233_v2 = vsel %vm232_vm0, %v228_v0, 0.0  ;;  %455 = vmatprep.subr.mxu0 %v684_v5  ;;  %v239_v6 = vld [vmem:[#allocation6] sm:$0xf]  ;;  %227 = vst.msk [vmem:[#allocation2] sm:$0x1] %vm226_vm1, %v684_v5  ;;  %vm685_vm2 = vmmov 0  }
  0x5a   : > { %456 = vmatpush3.msk.msra.mxu0 %vm232_vm0, %v239_v6  ;;  %457 = vmatprep.mubr.msk.f32.mxu0 %vm685_vm2, %v684_v5  ;;  %v242_v8 = vand.u32 127, %v241_v7  ;;  %v244_v9 = vshrl.u32 %v241_v7, 7  ;;  %vm247_vm3 = vcmask 31744   ;;  %v330_v17 = vld [vmem:[%s932_s2] sm:$0x1]  ;;  %s449_s24 = sshll.u32 %s672_s15, 4 }
  0x5b   : > { %v234_v3 = vsel %vm232_vm0, %v230_v1, 0.0  ;;  %s221_s8 = scalar_lea.vmem [#allocation8], %s858_s11  ;;  %s880_s26 = scalar_lea.hbm %s933_s3, %s449_s24 }
  0x5c   : > { %v235_v4 = vadd.f32 %v234_v3, %v233_v2  ;;  %v245_v10 = vsub.s32 %v242_v8, %v244_v9  ;;  %s347_s9 = sshll.u32 %s221_s8, 4  ;;  %s335_s30 = scalar_lea.sflag [#allocation5], %s858_s11  ;;  %s882_s9 = int_to_ptr.vmem [resolvable:$true] %s347_s9 }
  0x5d   : > { %s594_s4 = scalar_lea.vmem %s882_s9, 16  ;;  %s686_s15 = smov [#allocation8]  }
  0x5e   : > { %236 = vadd.xlane.f32.xlu0 %v235_v4  ;;  %p595_p11 = scmp.ne.s32.totalorder %s882_s9, %s594_s4  ;;  %s598_s6 = sshll.u32 %s686_s15, 4  ;;  %s599_s6 = int_to_ptr.vmem [resolvable:$false] %s598_s6 }
  0x5f   : > { %s600_s7 = scalar_lea.vmem %s599_s6, 32  ;;  %p601_p9 = scmp.lt.s32.totalorder %s882_s9, %s599_s6 }
  0x60   : > { %v238_v13 = vld [vmem:[#allocation2] sm:$0x1]  ;;  %p596_p6 = pnand %p595_p11, %p808_p13  ;;  %p602_p12 = scmp.lt.s32.totalorder %s600_s7, %s594_s4 }
  0x62   : > { %p597_p8 = pneg %p596_p6  ;;  %p603_p0 = por %p602_p12, %p601_p9 }
  0x64   : > { %p604_p5 = pnand %p603_p0, %p597_p8 }
  0xeb   : > { %v237_v11 = vpop.xlane.xlu0 %236 }
  0xec   : > { %v246_v12 = vrot.slane %v237_v11, %v245_v10 }
  0xee   : > { %458 = vmatmul.mubr.msk.f32.vlgmr.msra.gmra.mrb[0].mxu0 %vm247_vm3, %v246_v12 }
 0x1c1   : > { %v319_v14 = vpop.f32.mrb[0].mxu0 }
 0x1c2   : > { %v323_v15 = vadd.f32 %v319_v14, %v238_v13  ;;  %v459_v16 = vpop.f32.mrb[1].mxu0 }
 0x1c4   : > { %325 = vst.msk [vmem:[#allocation2] sm:$0x1] %vm226_vm1, %v323_v15 }
 0x1cb   : > { %v329_v18 = vld [vmem:[#allocation2] sm:$0x1] }
 0x1cc   : > { %v331_v19 = vadd.f32 %v330_v17, %v329_v18 }
 0x1ce   : > { %v332_v20 = vmax.f32 %v331_v19, 0.0 }
 0x1d0   : > { %333 = vst.msk [vmem:[%s221_s8] sm:$0x1] %vm226_vm1, %v332_v20 }
 0x1d1   : > { %607 = shalt.err (!%p604_p5)
}
 0x1d2   : > { %s608_s21 = scalar_lea.hbm %s880_s26, 16  ;;  %s612_s19 = scalar_lea.hbm %s933_s3, 32 }
 0x1d3   : > { %p609_p10 = scmp.ne.s32.totalorder %s880_s26, %s608_s21  ;;  %p613_p7 = scmp.lt.u32.totalorder %s880_s26, %s933_s3 }
 0x1d4   : > { %p614_p3 = scmp.lt.u32.totalorder %s612_s19, %s608_s21  ;;  %p616_p11 = scmp.lt.u32.totalorder %s608_s21, %s880_s26 }
 0x1d5   : > { %p610_p4 = pnand %p609_p10, %p808_p13 }
 0x1d6   : > { %p615_p2 = por %p614_p3, %p613_p7 }
 0x1d7   : > { %p611_p1 = pneg %p610_p4 }
 0x1d8   : > { %p617_p6 = por %p616_p11, %p615_p2 }
 0x1da   : > { %p618_p8 = pnand %p617_p6, %p611_p1 }
 0x1dc   : > { %621 = shalt.err (!%p618_p8)
}
 0x1dd   : > { %466 = dma.vmem_to_hbm [thread:$0]  (%p808_p13), %s882_s9, 16, %s880_s26, %s335_s30  }
 0x1de PF: > { %s359_s22 = sand.u32 1, %s660_s12   ;;  %p952_p9 = scmp.ne.s32.totalorder %s941_s23, 0 }
 0x1df   : > { %p953_p12 = scmp.ge.s32.totalorder %s680_s17, 2  ;;  %s360_s24 = scalar_lea.sflag [#allocation5], %s359_s22 }
 0x1e1   : > { %p477_p0 = pnand %p953_p12, %p952_p9 }
 0x1e3   : > { %655 = dma.done.wait (!%p477_p0), %s360_s24, 16  }
 0x1e4   : > { %657 = vsyncadd (!%p477_p0), %s360_s24, 4294967280  ;;  %s20_s17 = sadd.s32 1, %s680_s17   ;;  %s954_s12 = smov %s664_s13 }
 0x1e5   : > { %p17_p5 = scmp.ge.s32.totalorder %s20_s17, 4   ;;  %s955_s13 = smov %s668_s14 }
 0x1e6   : > { %s956_s14 = smov %s816_s5  ;;  %s957_s15 = smov %s676_s16 }
 0x1e7   : > { %s958_s16 = smov %s960_s28  ;;  %19 = sbr.rel (!%p17_p5) target bundleno = 7 (0x7), region = 90 }
 0x1ee   :  { %364 = vsyncpa [#allocation4], 1 }
 0x1ef   :  { %366 = vsyncpa [#allocation4 + $0x1], 1 }
 0x1f0   :  { %367 = vsyncpa [#allocation7], 1 }
 0x1f1   :  { %368 = vsyncpa [#allocation5], 1 }
 0x1f2   :  { %370 = vsyncpa [#allocation5 + $0x1], 1 }

</bundles_post_ra>
